<compile_context>
chip_gen: v7x
topology: tpu7x:2x2x1
jax: 0.10.0
libtpu: 0.0.40
codegen_flags: <defaults>
</compile_context>

<pallas_src>
import jax
import jax.numpy as jnp
from jax.experimental import pallas as pl
from jax.experimental.pallas import tpu as pltpu


def lstm_forward(x_btI, w_ih, w_hh, b_ih, b_hh, w_lin, b_lin, *,
                 batch_block=None, mxu_dtype=jnp.bfloat16):
    """x_btI: (B, T, I) batch_first, like the PyTorch module. Returns (B, 1)."""
    B, T, I = x_btI.shape
    H = w_hh.shape[1]
    H4 = 4 * H

    bb = B if batch_block is None else batch_block
    assert B % bb == 0, "batch_block must divide B"
    nb = B // bb
    if nb > 1:
        # (8,128) BlockSpec rule: sub-array blocks need sublane-multiple
        # second-to-last dims, otherwise lowering fails / stores get masked.
        assert bb % 8 == 0 and (bb * T) % 8 == 0, (
            "with nb > 1, bb and bb*T must be multiples of 8")

    # ---- Wrapper-side layout plumbing (all free / tiny) ----
    wih_t = jnp.transpose(w_ih).astype(mxu_dtype)        # (I, 4H)  MXU input
    whh_t = jnp.transpose(w_hh).astype(mxu_dtype)        # (H, 4H)  MXU input
    bias = (b_ih + b_hh).reshape(1, H4).astype(jnp.float32)   # (1, 4H), f32
    x_flat = x_btI.reshape(B * T, I).astype(mxu_dtype)   # contiguous flatten

    compute_dtype = mxu_dtype

    def kernel(x_ref, wih_ref, whh_ref, b_ref, h_out_ref):
        # ---- Phase 1: time-parallel input projection, one MXU matmul ----
        # (bb*T, I) @ (I, 4H) + bias  ->  (bb, T, 4H), f32 accumulation.
        # (I=4 leaves the MXU K-dim mostly idle, but this runs once and stays
        #  in-kernel to avoid an HBM round trip of a 4H-wide xp.)
        xp = jnp.dot(x_ref[...], wih_ref[...],
                     preferred_element_type=jnp.float32) + b_ref[...]
        xp = xp.reshape(bb, T, H4)

        whh = whh_ref[...]                       # resident across all steps
        h = jnp.zeros((bb, H), jnp.float32)      # state stays f32
        c = jnp.zeros((bb, H), jnp.float32)

        # ---- Phase 2: serial recurrence, fully unrolled (T static & small) ----
        # Per step: one (bb, H) @ (H, 4H) bf16 MXU matmul + fused gate math.
        for t in range(T):
            gates = xp[:, t, :] + jnp.dot(h.astype(compute_dtype), whh,
                                          preferred_element_type=jnp.float32)
            # Fused full-width nonlinearities: 2 EUP pushes (128 lanes each)
            # instead of 4 narrow (32-lane) pushes per timestep.
            sig = jax.nn.sigmoid(gates)          # i, f, o come from here
            th = jnp.tanh(gates)                 # g comes from here
            i_g = sig[:, 0 * H:1 * H]
            f_g = sig[:, 1 * H:2 * H]            # lane-offset slices: 3 XLU
            g_g = th[:, 2 * H:3 * H]             # rotates/step, irreducible at
            o_g = sig[:, 3 * H:4 * H]            # H=32 (keep H%128==0 at scale)
            c = f_g * c + i_g * g_g
            h = o_g * jnp.tanh(c)

        # Single final (bb, H) store; negligible writeback at these shapes.
        h_out_ref[...] = h.astype(h_out_ref.dtype)

    h_T = pl.pallas_call(
        kernel,
        out_shape=jax.ShapeDtypeStruct((B, H), jnp.float32),
        grid=(nb,),                                   # 1 block here; >1 splits batch (v7x)
        in_specs=[
            pl.BlockSpec((bb * T, I), lambda b: (b, 0)),   # per-batch-block rows of x
            pl.BlockSpec((I, H4), lambda b: (0, 0)),       # W_ih^T (grid-invariant)
            pl.BlockSpec((H, H4), lambda b: (0, 0)),       # W_hh^T (grid-invariant)
            pl.BlockSpec((1, H4), lambda b: (0, 0)),       # combined bias (invariant)
        ],
        out_specs=pl.BlockSpec((bb, H), lambda b: (b, 0)),
        compiler_params=pltpu.CompilerParams(
            dimension_semantics=("parallel",)),            # batch blocks independent
    )(x_flat, wih_t, whh_t, bias)

    # Lane-narrow Linear(H, 1) head stays outside the kernel (trivial VPU work;
    # avoids an N=1 MXU matmul and a single-lane masked store in the kernel).
    return h_T @ jnp.transpose(w_lin) + b_lin


def lstm_reference(x_btI, w_ih, w_hh, b_ih, b_hh, w_lin, b_lin, *,
                   mxu_dtype=jnp.float32):
    """Pure-JAX reference matching torch.nn.LSTM semantics (gate order i,f,g,o).

    If mxu_dtype is bfloat16, matmul operands are cast to bf16 (f32 accumulate)
    to mirror the kernel's MXU numerics for a tight comparison."""
    B, T, I = x_btI.shape
    H = w_hh.shape[1]
    wih_t = w_ih.T.astype(mxu_dtype)
    whh_t = w_hh.T.astype(mxu_dtype)
    bias = (b_ih + b_hh).astype(jnp.float32)
    h = jnp.zeros((B, H), jnp.float32)
    c = jnp.zeros((B, H), jnp.float32)

    def step(carry, x_t):
        h, c = carry
        gates = (jnp.dot(x_t.astype(mxu_dtype), wih_t,
                         preferred_element_type=jnp.float32)
                 + jnp.dot(h.astype(mxu_dtype), whh_t,
                           preferred_element_type=jnp.float32)
                 + bias)
        i = jax.nn.sigmoid(gates[:, 0 * H:1 * H])
        f = jax.nn.sigmoid(gates[:, 1 * H:2 * H])
        g = jnp.tanh(gates[:, 2 * H:3 * H])
        o = jax.nn.sigmoid(gates[:, 3 * H:4 * H])
        c = f * c + i * g
        h = o * jnp.tanh(c)
        return (h, c), None

    (h, c), _ = jax.lax.scan(step, (h, c), jnp.transpose(x_btI, (1, 0, 2)))
    return h @ w_lin.T + b_lin


if __name__ == "__main__":
    # Small shapes consistent with the module: batch=2, seq=8, input_size=4, hidden=32.
    B, T, I, H = 2, 8, 4, 32

    key = jax.random.PRNGKey(0)
    k_x, k1, k2, k3, k4, k5, k6 = jax.random.split(key, 7)

    x = jax.random.normal(k_x, (B, T, I), jnp.float32)

    # PyTorch-style init: U(-1/sqrt(H), 1/sqrt(H)).
    s = 1.0 / jnp.sqrt(H)
    w_ih = jax.random.uniform(k1, (4 * H, I), jnp.float32, -s, s)
    w_hh = jax.random.uniform(k2, (4 * H, H), jnp.float32, -s, s)
    b_ih = jax.random.uniform(k3, (4 * H,), jnp.float32, -s, s)
    b_hh = jax.random.uniform(k4, (4 * H,), jnp.float32, -s, s)
    w_lin = jax.random.uniform(k5, (1, H), jnp.float32, -s, s)
    b_lin = jax.random.uniform(k6, (1,), jnp.float32, -s, s)

    # Optimized path: bf16 MXU inputs, f32 accumulate/state.
    out_bf16 = jax.block_until_ready(
        lstm_forward(x, w_ih, w_hh, b_ih, b_hh, w_lin, b_lin,
                     mxu_dtype=jnp.bfloat16))
    # Full-precision path (same kernel, f32 matmul inputs).
    out_f32 = jax.block_until_ready(
        lstm_forward(x, w_ih, w_hh, b_ih, b_hh, w_lin, b_lin,
                     mxu_dtype=jnp.float32))

    ref_f32 = lstm_reference(x, w_ih, w_hh, b_ih, b_hh, w_lin, b_lin)
    ref_bf16 = lstm_reference(x, w_ih, w_hh, b_ih, b_hh, w_lin, b_lin,
                              mxu_dtype=jnp.bfloat16)

    assert out_f32.shape == (B, 1) and out_bf16.shape == (B, 1)
    # f32 kernel path vs pure-f32 reference: tight.
    assert jnp.allclose(out_f32, ref_f32, atol=1e-5, rtol=1e-5), (out_f32, ref_f32)
    # bf16-MXU kernel path vs numerics-matched reference: tight.
    assert jnp.allclose(out_bf16, ref_bf16, atol=1e-3, rtol=1e-3), (out_bf16, ref_bf16)

    print("KERNEL_OK")
</pallas_src>

<mosaic_0001>
module attributes {stable_mosaic.version = 11 : i64} {
  func.func @kernel(%arg0: i32, %arg1: memref<16x4xbf16, #tpu.memory_space<vmem>>, %arg2: memref<4x128xbf16, #tpu.memory_space<vmem>>, %arg3: memref<32x128xbf16, #tpu.memory_space<vmem>>, %arg4: memref<1x128xf32, #tpu.memory_space<vmem>>, %arg5: memref<2x32xf32, #tpu.memory_space<vmem>>) attributes {dimension_semantics = [#tpu.dimension_semantics<parallel>], iteration_bounds = array<i64: 1>, scalar_prefetch = 0 : i64, scratch_operands = 0 : i64, tpu.core_type = #tpu.core_type<tc>, window_params = [{transform_indices = @transform_0, window_bounds = array<i64: 16, 4>}, {pipeline_mode = #tpu.pipeline_mode<synchronous>, transform_indices = @transform_1, window_bounds = array<i64: 4, 128>}, {pipeline_mode = #tpu.pipeline_mode<synchronous>, transform_indices = @transform_2, window_bounds = array<i64: 32, 128>}, {pipeline_mode = #tpu.pipeline_mode<synchronous>, transform_indices = @transform_3, window_bounds = array<i64: 1, 128>}, {transform_indices = @transform_4, window_bounds = array<i64: 2, 32>}]} {
    %c0 = arith.constant 0 : index
    %c0_0 = arith.constant 0 : index
    %0 = vector.load %arg1[%c0, %c0_0] : memref<16x4xbf16, #tpu.memory_space<vmem>>, vector<16x4xbf16>
    %c0_1 = arith.constant 0 : index
    %c0_2 = arith.constant 0 : index
    %1 = vector.load %arg2[%c0_1, %c0_2] : memref<4x128xbf16, #tpu.memory_space<vmem>>, vector<4x128xbf16>
    %cst = arith.constant dense<0.000000e+00> : vector<16x128xf32>
    %2 = tpu.matmul %0, %1, %cst {dimension_numbers = #tpu.dot_dimension_numbers<[1], [0], [0], [1], [0, 0, 1, 1], [], []>} : vector<16x4xbf16>, vector<4x128xbf16>, vector<16x128xf32> -> vector<16x128xf32>
    %c0_3 = arith.constant 0 : index
    %c0_4 = arith.constant 0 : index
    %3 = vector.load %arg4[%c0_3, %c0_4] : memref<1x128xf32, #tpu.memory_space<vmem>>, vector<1x128xf32>
    %4 = vector.broadcast %3 : vector<1x128xf32> to vector<16x128xf32>
    %5 = arith.addf %2, %4 : vector<16x128xf32>
    %6 = vector.shape_cast %5 : vector<16x128xf32> to vector<2x8x128xf32>
    %c0_5 = arith.constant 0 : index
    %c0_6 = arith.constant 0 : index
    %7 = vector.load %arg3[%c0_5, %c0_6] : memref<32x128xbf16, #tpu.memory_space<vmem>>, vector<32x128xbf16>
    %cst_7 = arith.constant 0.000000e+00 : f32
    %8 = vector.broadcast %cst_7 : f32 to vector<2x32xf32>
    %cst_8 = arith.constant 0.000000e+00 : f32
    %9 = vector.broadcast %cst_8 : f32 to vector<2x32xf32>
    %10 = vector.extract_strided_slice %6 {offsets = [0, 0, 0], sizes = [2, 1, 128], strides = [1, 1, 1]} : vector<2x8x128xf32> to vector<2x1x128xf32>
    %11 = vector.shape_cast %10 : vector<2x1x128xf32> to vector<2x128xf32>
    %12 = arith.truncf %8 : vector<2x32xf32> to vector<2x32xbf16>
    %cst_9 = arith.constant dense<0.000000e+00> : vector<2x128xf32>
    %13 = tpu.matmul %12, %7, %cst_9 {dimension_numbers = #tpu.dot_dimension_numbers<[1], [0], [0], [1], [0, 0, 1, 1], [], []>} : vector<2x32xbf16>, vector<32x128xbf16>, vector<2x128xf32> -> vector<2x128xf32>
    %14 = arith.addf %11, %13 : vector<2x128xf32>
    %15 = arith.negf %14 : vector<2x128xf32>
    %16 = math.exp %15 : vector<2x128xf32>
    %cst_10 = arith.constant 1.000000e+00 : f32
    %17 = vector.broadcast %cst_10 : f32 to vector<2x128xf32>
    %18 = arith.addf %17, %16 : vector<2x128xf32>
    %19 = arith.divf %17, %18 : vector<2x128xf32>
    %20 = math.tanh %14 : vector<2x128xf32>
    %21 = vector.extract_strided_slice %19 {offsets = [0, 0], sizes = [2, 32], strides = [1, 1]} : vector<2x128xf32> to vector<2x32xf32>
    %22 = vector.extract_strided_slice %19 {offsets = [0, 32], sizes = [2, 32], strides = [1, 1]} : vector<2x128xf32> to vector<2x32xf32>
    %23 = vector.extract_strided_slice %20 {offsets = [0, 64], sizes = [2, 32], strides = [1, 1]} : vector<2x128xf32> to vector<2x32xf32>
    %24 = vector.extract_strided_slice %19 {offsets = [0, 96], sizes = [2, 32], strides = [1, 1]} : vector<2x128xf32> to vector<2x32xf32>
    %25 = arith.mulf %22, %9 : vector<2x32xf32>
    %26 = arith.mulf %21, %23 : vector<2x32xf32>
    %27 = arith.addf %25, %26 : vector<2x32xf32>
    %28 = math.tanh %27 : vector<2x32xf32>
    %29 = arith.mulf %24, %28 : vector<2x32xf32>
    %30 = vector.extract_strided_slice %6 {offsets = [0, 1, 0], sizes = [2, 1, 128], strides = [1, 1, 1]} : vector<2x8x128xf32> to vector<2x1x128xf32>
    %31 = vector.shape_cast %30 : vector<2x1x128xf32> to vector<2x128xf32>
    %32 = arith.truncf %29 : vector<2x32xf32> to vector<2x32xbf16>
    %cst_11 = arith.constant dense<0.000000e+00> : vector<2x128xf32>
    %33 = tpu.matmul %32, %7, %cst_11 {dimension_numbers = #tpu.dot_dimension_numbers<[1], [0], [0], [1], [0, 0, 1, 1], [], []>} : vector<2x32xbf16>, vector<32x128xbf16>, vector<2x128xf32> -> vector<2x128xf32>
    %34 = arith.addf %31, %33 : vector<2x128xf32>
    %35 = arith.negf %34 : vector<2x128xf32>
    %36 = math.exp %35 : vector<2x128xf32>
    %cst_12 = arith.constant 1.000000e+00 : f32
    %37 = vector.broadcast %cst_12 : f32 to vector<2x128xf32>
    %38 = arith.addf %37, %36 : vector<2x128xf32>
    %39 = arith.divf %37, %38 : vector<2x128xf32>
    %40 = math.tanh %34 : vector<2x128xf32>
    %41 = vector.extract_strided_slice %39 {offsets = [0, 0], sizes = [2, 32], strides = [1, 1]} : vector<2x128xf32> to vector<2x32xf32>
    %42 = vector.extract_strided_slice %39 {offsets = [0, 32], sizes = [2, 32], strides = [1, 1]} : vector<2x128xf32> to vector<2x32xf32>
    %43 = vector.extract_strided_slice %40 {offsets = [0, 64], sizes = [2, 32], strides = [1, 1]} : vector<2x128xf32> to vector<2x32xf32>
    %44 = vector.extract_strided_slice %39 {offsets = [0, 96], sizes = [2, 32], strides = [1, 1]} : vector<2x128xf32> to vector<2x32xf32>
    %45 = arith.mulf %42, %27 : vector<2x32xf32>
    %46 = arith.mulf %41, %43 : vector<2x32xf32>
    %47 = arith.addf %45, %46 : vector<2x32xf32>
    %48 = math.tanh %47 : vector<2x32xf32>
    %49 = arith.mulf %44, %48 : vector<2x32xf32>
    %50 = vector.extract_strided_slice %6 {offsets = [0, 2, 0], sizes = [2, 1, 128], strides = [1, 1, 1]} : vector<2x8x128xf32> to vector<2x1x128xf32>
    %51 = vector.shape_cast %50 : vector<2x1x128xf32> to vector<2x128xf32>
    %52 = arith.truncf %49 : vector<2x32xf32> to vector<2x32xbf16>
    %cst_13 = arith.constant dense<0.000000e+00> : vector<2x128xf32>
    %53 = tpu.matmul %52, %7, %cst_13 {dimension_numbers = #tpu.dot_dimension_numbers<[1], [0], [0], [1], [0, 0, 1, 1], [], []>} : vector<2x32xbf16>, vector<32x128xbf16>, vector<2x128xf32> -> vector<2x128xf32>
    %54 = arith.addf %51, %53 : vector<2x128xf32>
    %55 = arith.negf %54 : vector<2x128xf32>
    %56 = math.exp %55 : vector<2x128xf32>
    %cst_14 = arith.constant 1.000000e+00 : f32
    %57 = vector.broadcast %cst_14 : f32 to vector<2x128xf32>
    %58 = arith.addf %57, %56 : vector<2x128xf32>
    %59 = arith.divf %57, %58 : vector<2x128xf32>
    %60 = math.tanh %54 : vector<2x128xf32>
    %61 = vector.extract_strided_slice %59 {offsets = [0, 0], sizes = [2, 32], strides = [1, 1]} : vector<2x128xf32> to vector<2x32xf32>
    %62 = vector.extract_strided_slice %59 {offsets = [0, 32], sizes = [2, 32], strides = [1, 1]} : vector<2x128xf32> to vector<2x32xf32>
    %63 = vector.extract_strided_slice %60 {offsets = [0, 64], sizes = [2, 32], strides = [1, 1]} : vector<2x128xf32> to vector<2x32xf32>
    %64 = vector.extract_strided_slice %59 {offsets = [0, 96], sizes = [2, 32], strides = [1, 1]} : vector<2x128xf32> to vector<2x32xf32>
    %65 = arith.mulf %62, %47 : vector<2x32xf32>
    %66 = arith.mulf %61, %63 : vector<2x32xf32>
    %67 = arith.addf %65, %66 : vector<2x32xf32>
    %68 = math.tanh %67 : vector<2x32xf32>
    %69 = arith.mulf %64, %68 : vector<2x32xf32>
    %70 = vector.extract_strided_slice %6 {offsets = [0, 3, 0], sizes = [2, 1, 128], strides = [1, 1, 1]} : vector<2x8x128xf32> to vector<2x1x128xf32>
    %71 = vector.shape_cast %70 : vector<2x1x128xf32> to vector<2x128xf32>
    %72 = arith.truncf %69 : vector<2x32xf32> to vector<2x32xbf16>
    %cst_15 = arith.constant dense<0.000000e+00> : vector<2x128xf32>
    %73 = tpu.matmul %72, %7, %cst_15 {dimension_numbers = #tpu.dot_dimension_numbers<[1], [0], [0], [1], [0, 0, 1, 1], [], []>} : vector<2x32xbf16>, vector<32x128xbf16>, vector<2x128xf32> -> vector<2x128xf32>
    %74 = arith.addf %71, %73 : vector<2x128xf32>
    %75 = arith.negf %74 : vector<2x128xf32>
    %76 = math.exp %75 : vector<2x128xf32>
    %cst_16 = arith.constant 1.000000e+00 : f32
    %77 = vector.broadcast %cst_16 : f32 to vector<2x128xf32>
    %78 = arith.addf %77, %76 : vector<2x128xf32>
    %79 = arith.divf %77, %78 : vector<2x128xf32>
    %80 = math.tanh %74 : vector<2x128xf32>
    %81 = vector.extract_strided_slice %79 {offsets = [0, 0], sizes = [2, 32], strides = [1, 1]} : vector<2x128xf32> to vector<2x32xf32>
    %82 = vector.extract_strided_slice %79 {offsets = [0, 32], sizes = [2, 32], strides = [1, 1]} : vector<2x128xf32> to vector<2x32xf32>
    %83 = vector.extract_strided_slice %80 {offsets = [0, 64], sizes = [2, 32], strides = [1, 1]} : vector<2x128xf32> to vector<2x32xf32>
    %84 = vector.extract_strided_slice %79 {offsets = [0, 96], sizes = [2, 32], strides = [1, 1]} : vector<2x128xf32> to vector<2x32xf32>
    %85 = arith.mulf %82, %67 : vector<2x32xf32>
    %86 = arith.mulf %81, %83 : vector<2x32xf32>
    %87 = arith.addf %85, %86 : vector<2x32xf32>
    %88 = math.tanh %87 : vector<2x32xf32>
    %89 = arith.mulf %84, %88 : vector<2x32xf32>
    %90 = vector.extract_strided_slice %6 {offsets = [0, 4, 0], sizes = [2, 1, 128], strides = [1, 1, 1]} : vector<2x8x128xf32> to vector<2x1x128xf32>
    %91 = vector.shape_cast %90 : vector<2x1x128xf32> to vector<2x128xf32>
    %92 = arith.truncf %89 : vector<2x32xf32> to vector<2x32xbf16>
    %cst_17 = arith.constant dense<0.000000e+00> : vector<2x128xf32>
    %93 = tpu.matmul %92, %7, %cst_17 {dimension_numbers = #tpu.dot_dimension_numbers<[1], [0], [0], [1], [0, 0, 1, 1], [], []>} : vector<2x32xbf16>, vector<32x128xbf16>, vector<2x128xf32> -> vector<2x128xf32>
    %94 = arith.addf %91, %93 : vector<2x128xf32>
    %95 = arith.negf %94 : vector<2x128xf32>
    %96 = math.exp %95 : vector<2x128xf32>
    %cst_18 = arith.constant 1.000000e+00 : f32
    %97 = vector.broadcast %cst_18 : f32 to vector<2x128xf32>
    %98 = arith.addf %97, %96 : vector<2x128xf32>
    %99 = arith.divf %97, %98 : vector<2x128xf32>
    %100 = math.tanh %94 : vector<2x128xf32>
    %101 = vector.extract_strided_slice %99 {offsets = [0, 0], sizes = [2, 32], strides = [1, 1]} : vector<2x128xf32> to vector<2x32xf32>
    %102 = vector.extract_strided_slice %99 {offsets = [0, 32], sizes = [2, 32], strides = [1, 1]} : vector<2x128xf32> to vector<2x32xf32>
    %103 = vector.extract_strided_slice %100 {offsets = [0, 64], sizes = [2, 32], strides = [1, 1]} : vector<2x128xf32> to vector<2x32xf32>
    %104 = vector.extract_strided_slice %99 {offsets = [0, 96], sizes = [2, 32], strides = [1, 1]} : vector<2x128xf32> to vector<2x32xf32>
    %105 = arith.mulf %102, %87 : vector<2x32xf32>
    %106 = arith.mulf %101, %103 : vector<2x32xf32>
    %107 = arith.addf %105, %106 : vector<2x32xf32>
    %108 = math.tanh %107 : vector<2x32xf32>
    %109 = arith.mulf %104, %108 : vector<2x32xf32>
    %110 = vector.extract_strided_slice %6 {offsets = [0, 5, 0], sizes = [2, 1, 128], strides = [1, 1, 1]} : vector<2x8x128xf32> to vector<2x1x128xf32>
    %111 = vector.shape_cast %110 : vector<2x1x128xf32> to vector<2x128xf32>
    %112 = arith.truncf %109 : vector<2x32xf32> to vector<2x32xbf16>
    %cst_19 = arith.constant dense<0.000000e+00> : vector<2x128xf32>
    %113 = tpu.matmul %112, %7, %cst_19 {dimension_numbers = #tpu.dot_dimension_numbers<[1], [0], [0], [1], [0, 0, 1, 1], [], []>} : vector<2x32xbf16>, vector<32x128xbf16>, vector<2x128xf32> -> vector<2x128xf32>
    %114 = arith.addf %111, %113 : vector<2x128xf32>
    %115 = arith.negf %114 : vector<2x128xf32>
    %116 = math.exp %115 : vector<2x128xf32>
    %cst_20 = arith.constant 1.000000e+00 : f32
    %117 = vector.broadcast %cst_20 : f32 to vector<2x128xf32>
    %118 = arith.addf %117, %116 : vector<2x128xf32>
    %119 = arith.divf %117, %118 : vector<2x128xf32>
    %120 = math.tanh %114 : vector<2x128xf32>
    %121 = vector.extract_strided_slice %119 {offsets = [0, 0], sizes = [2, 32], strides = [1, 1]} : vector<2x128xf32> to vector<2x32xf32>
    %122 = vector.extract_strided_slice %119 {offsets = [0, 32], sizes = [2, 32], strides = [1, 1]} : vector<2x128xf32> to vector<2x32xf32>
    %123 = vector.extract_strided_slice %120 {offsets = [0, 64], sizes = [2, 32], strides = [1, 1]} : vector<2x128xf32> to vector<2x32xf32>
    %124 = vector.extract_strided_slice %119 {offsets = [0, 96], sizes = [2, 32], strides = [1, 1]} : vector<2x128xf32> to vector<2x32xf32>
    %125 = arith.mulf %122, %107 : vector<2x32xf32>
    %126 = arith.mulf %121, %123 : vector<2x32xf32>
    %127 = arith.addf %125, %126 : vector<2x32xf32>
    %128 = math.tanh %127 : vector<2x32xf32>
    %129 = arith.mulf %124, %128 : vector<2x32xf32>
    %130 = vector.extract_strided_slice %6 {offsets = [0, 6, 0], sizes = [2, 1, 128], strides = [1, 1, 1]} : vector<2x8x128xf32> to vector<2x1x128xf32>
    %131 = vector.shape_cast %130 : vector<2x1x128xf32> to vector<2x128xf32>
    %132 = arith.truncf %129 : vector<2x32xf32> to vector<2x32xbf16>
    %cst_21 = arith.constant dense<0.000000e+00> : vector<2x128xf32>
    %133 = tpu.matmul %132, %7, %cst_21 {dimension_numbers = #tpu.dot_dimension_numbers<[1], [0], [0], [1], [0, 0, 1, 1], [], []>} : vector<2x32xbf16>, vector<32x128xbf16>, vector<2x128xf32> -> vector<2x128xf32>
    %134 = arith.addf %131, %133 : vector<2x128xf32>
    %135 = arith.negf %134 : vector<2x128xf32>
    %136 = math.exp %135 : vector<2x128xf32>
    %cst_22 = arith.constant 1.000000e+00 : f32
    %137 = vector.broadcast %cst_22 : f32 to vector<2x128xf32>
    %138 = arith.addf %137, %136 : vector<2x128xf32>
    %139 = arith.divf %137, %138 : vector<2x128xf32>
    %140 = math.tanh %134 : vector<2x128xf32>
    %141 = vector.extract_strided_slice %139 {offsets = [0, 0], sizes = [2, 32], strides = [1, 1]} : vector<2x128xf32> to vector<2x32xf32>
    %142 = vector.extract_strided_slice %139 {offsets = [0, 32], sizes = [2, 32], strides = [1, 1]} : vector<2x128xf32> to vector<2x32xf32>
    %143 = vector.extract_strided_slice %140 {offsets = [0, 64], sizes = [2, 32], strides = [1, 1]} : vector<2x128xf32> to vector<2x32xf32>
    %144 = vector.extract_strided_slice %139 {offsets = [0, 96], sizes = [2, 32], strides = [1, 1]} : vector<2x128xf32> to vector<2x32xf32>
    %145 = arith.mulf %142, %127 : vector<2x32xf32>
    %146 = arith.mulf %141, %143 : vector<2x32xf32>
    %147 = arith.addf %145, %146 : vector<2x32xf32>
    %148 = math.tanh %147 : vector<2x32xf32>
    %149 = arith.mulf %144, %148 : vector<2x32xf32>
    %150 = vector.extract_strided_slice %6 {offsets = [0, 7, 0], sizes = [2, 1, 128], strides = [1, 1, 1]} : vector<2x8x128xf32> to vector<2x1x128xf32>
    %151 = vector.shape_cast %150 : vector<2x1x128xf32> to vector<2x128xf32>
    %152 = arith.truncf %149 : vector<2x32xf32> to vector<2x32xbf16>
    %cst_23 = arith.constant dense<0.000000e+00> : vector<2x128xf32>
    %153 = tpu.matmul %152, %7, %cst_23 {dimension_numbers = #tpu.dot_dimension_numbers<[1], [0], [0], [1], [0, 0, 1, 1], [], []>} : vector<2x32xbf16>, vector<32x128xbf16>, vector<2x128xf32> -> vector<2x128xf32>
    %154 = arith.addf %151, %153 : vector<2x128xf32>
    %155 = arith.negf %154 : vector<2x128xf32>
    %156 = math.exp %155 : vector<2x128xf32>
    %cst_24 = arith.constant 1.000000e+00 : f32
    %157 = vector.broadcast %cst_24 : f32 to vector<2x128xf32>
    %158 = arith.addf %157, %156 : vector<2x128xf32>
    %159 = arith.divf %157, %158 : vector<2x128xf32>
    %160 = math.tanh %154 : vector<2x128xf32>
    %161 = vector.extract_strided_slice %159 {offsets = [0, 0], sizes = [2, 32], strides = [1, 1]} : vector<2x128xf32> to vector<2x32xf32>
    %162 = vector.extract_strided_slice %159 {offsets = [0, 32], sizes = [2, 32], strides = [1, 1]} : vector<2x128xf32> to vector<2x32xf32>
    %163 = vector.extract_strided_slice %160 {offsets = [0, 64], sizes = [2, 32], strides = [1, 1]} : vector<2x128xf32> to vector<2x32xf32>
    %164 = vector.extract_strided_slice %159 {offsets = [0, 96], sizes = [2, 32], strides = [1, 1]} : vector<2x128xf32> to vector<2x32xf32>
    %165 = arith.mulf %162, %147 : vector<2x32xf32>
    %166 = arith.mulf %161, %163 : vector<2x32xf32>
    %167 = arith.addf %165, %166 : vector<2x32xf32>
    %168 = math.tanh %167 : vector<2x32xf32>
    %169 = arith.mulf %164, %168 : vector<2x32xf32>
    %c0_25 = arith.constant 0 : index
    %c0_26 = arith.constant 0 : index
    %170 = vector.load %arg5[%c0_25, %c0_26] : memref<2x32xf32, #tpu.memory_space<vmem>>, vector<2x32xf32>
    tpu.vector_store %arg5[%c0_25, %c0_26], %169 {strides = array<i32>} : memref<2x32xf32, #tpu.memory_space<vmem>>, vector<2x32xf32>,
    return
  }
  func.func @transform_0(%arg0: i32) -> (i32, i32) {
    %c0_i32 = arith.constant 0 : i32
    %c0_i32_0 = arith.constant 0 : i32
    return %arg0, %c0_i32 : i32, i32
  }
  func.func @transform_1(%arg0: i32) -> (i32, i32) {
    %c0_i32 = arith.constant 0 : i32
    %c0_i32_0 = arith.constant 0 : i32
    %c0_i32_1 = arith.constant 0 : i32
    return %c0_i32, %c0_i32_0 : i32, i32
  }
  func.func @transform_2(%arg0: i32) -> (i32, i32) {
    %c0_i32 = arith.constant 0 : i32
    %c0_i32_0 = arith.constant 0 : i32
    %c0_i32_1 = arith.constant 0 : i32
    return %c0_i32, %c0_i32_0 : i32, i32
  }
  func.func @transform_3(%arg0: i32) -> (i32, i32) {
    %c0_i32 = arith.constant 0 : i32
    %c0_i32_0 = arith.constant 0 : i32
    %c0_i32_1 = arith.constant 0 : i32
    return %c0_i32, %c0_i32_0 : i32, i32
  }
  func.func @transform_4(%arg0: i32) -> (i32, i32) {
    %c0_i32 = arith.constant 0 : i32
    %c0_i32_0 = arith.constant 0 : i32
    return %arg0, %c0_i32 : i32, i32
  }
}

</mosaic_0001>

<bundles_post_ra>
// kernel: tpu_custom_call.1
= control target key start
LH: loop header
LB: loop body
LE: loop exit
PB: predicated region body
PF: predicated region fallthrough
CT: control target
= control target key end

     0   :  { %9 = vsyncpa [#allocation3], 0  ;;  %s1591_s0 = inlined_call_operand.vmem [shape: bf16[16,4], index: 0, kind: input, shape index: {}]   ;;  %s1592_s1 = inlined_call_operand.hbm [shape: bf16[4,128], index: 1, kind: input, shape index: {}]   ;;  %s1593_s2 = inlined_call_operand.vmem [shape: bf16[32,128], index: 2, kind: input, shape index: {}]   ;;  %s1594_s3 = inlined_call_operand.vmem [shape: f32[1,128], index: 3, kind: input, shape index: {}]   ;;  %s1595_s4 = inlined_call_operand.hbm [shape: f32[2,32], index: 4, kind: output, shape index: {}]  }
   0x1   :  { %10 = vsyncpa [#allocation4], 0  ;;  %s1357_s15 = smov [#allocation2]   ;;  %s1309_s19 = scalar_lea.hbm %s1592_s1, 32 }
   0x2   :  { %s19_s16 = sshll.u32 %s1357_s15, 4  ;;  %p1310_p0 = scmp.ne.s32.totalorder %s1592_s1, %s1309_s19  ;;  %s20_s16 = int_to_ptr.vmem [resolvable:$true] %s19_s16 }
   0x3   :  { %p1313_p1 = scmp.lt.u32.totalorder %s1309_s19, %s1592_s1 }
   0x5   :  { %p1315_p2 = pnand %p1313_p1, %p1310_p0 }
   0x7   :  { %1318 = shalt.err (!%p1315_p2)
}
   0x8   :  { %s1319_s24 = scalar_lea.vmem %s20_s16, 32  ;;  %p1324_p4 = scmp.lt.s32.totalorder %s20_s16, %s20_s16 }
   0x9   :  { %p1320_p3 = scmp.ne.s32.totalorder %s20_s16, %s1319_s24  ;;  %p1325_p5 = scmp.lt.s32.totalorder %s1319_s24, %s1319_s24 }
   0xb   :  { %p1326_p6 = por %p1325_p5, %p1324_p4 }
   0xd   :  { %p1327_p7 = pnand %p1326_p6, %p1320_p3 }
   0xf   :  { %1330 = shalt.err (!%p1327_p7)
}
  0x10   :  { %22 = dma.hbm_to_vmem [thread:$0]  %s1592_s1, 32, %s20_s16, [#allocation3]  }
  0x11   :  { %1353 = dma.done.wait [#allocation3], 32  }
  0x12   :  { %1354 = vsyncadd [#allocation3], 4294967264  ;;  %v1358_v0 = vmov 0.0   ;;  %vm1359_vm0 = vmmov 0   ;;  %vm50_vm1 = vcmask 1041408   ;;  %v1410_v3 = vld [vmem:[%s1593_s2] sm:$0xff]  }
  0x13   :  { %1101 = vmatprep.subr.bf16.mxu0 %v1358_v0  ;;  %1107 = vmatprep.subr.bf16.mxu1 %v1358_v0  ;;  %v33_v1 = vld [vmem:[#allocation2] sm:$0x3]  ;;  %v1179_v4 = vld [vmem:[%s1591_s0] sm:$0xff]   ;;  %vm46_vm2 = vcmask 31744   ;;  %v1419_v5 = vld [vmem:[%s1593_s2 + $0x8] sm:$0xff]   ;;  %v1360_v6 = vmov 0  }
  0x14   :  { %1103 = vmatprep.mubr.msk.bf16.mxu0 %vm1359_vm0, %v1358_v0  ;;  %1111 = vmatprep.mubr.msk.bf16.mxu1 %vm1359_vm0, %v1358_v0  ;;  %v52_v2 = vsel %vm50_vm1, %v33_v1, 0  ;;  %v1047_v10 = vld [vmem:[%s1594_s3] ss:$0 sm:$0xff]  ;;  %s1361_s6 = smov 64   ;;  %s1362_s3 = smov 32   ;;  %vm216_vm3 = vcmask 1041409  }
  0x15   :  { %1102 = vmatpush3.bf16.msra.mxu0 %v52_v2  ;;  %1108 = vmatpush3.bf16.msra.mxu1 %v1410_v3  ;;  %vm111_vm4 = vcmask 261120   ;;  %vm1028_vm5 = vcmask 261127   ;;  %s1363_s7 = smov [#allocation5]   ;;  %vm1030_vm6 = vcmask 253952  }
  0x16   :  { %1115 = vmatprep.subr.bf16.mxu0 %v1358_v0  ;;  %1109 = vmatprep.subr.bf16.mxu1 %v1358_v0  ;;  %s1038_s8 = sshll.u32 %s1363_s7, 4  ;;  %s1039_s8 = int_to_ptr.vmem [resolvable:$true] %s1038_s8 }
  0x17   :  { %s1331_s9 = scalar_lea.vmem %s1039_s8, 32  ;;  %p1336_p9 = scmp.lt.s32.totalorder %s1039_s8, %s1039_s8 }
  0x18   :  { %1104 = vmatmul.mubr.msk.bf16.vlgmr.msra.gmra.mrb[0].mxu0 %vm46_vm2, %v1179_v4  ;;  %p1332_p8 = scmp.ne.s32.totalorder %s1039_s8, %s1331_s9  ;;  %p1337_p10 = scmp.lt.s32.totalorder %s1331_s9, %s1331_s9 }
  0x19   :  { %1116 = vmatpush3.bf16.msra.mxu0 %v1410_v3  ;;  %1119 = vmatprep.mubr.msk.bf16.mxu0 %vm1359_vm0, %v1358_v0 }
  0x1a   :  { %1110 = vmatpush3.bf16.msra.mxu1 %v1419_v5  ;;  %1117 = vmatprep.subr.bf16.mxu0 %v1358_v0  ;;  %p1338_p11 = por %p1337_p10, %p1336_p9 }
  0x1b   :  { %1123 = vmatprep.subr.bf16.mxu1 %v1358_v0 }
  0x1c   :  { %p1339_p12 = pnand %p1338_p11, %p1332_p8 }
  0x1d   :  { %1112 = vmatmul.mubr.bf16.vlgmr.msra.gmra.mrb[0].mxu1 %v1360_v6  ;;  %1118 = vmatpush3.bf16.msra.mxu0 %v1419_v5 }
  0x1e   :  { %1124 = vmatpush3.bf16.msra.mxu1 %v1410_v3  ;;  %1127 = vmatprep.mubr.msk.bf16.mxu1 %vm1359_vm0, %v1358_v0 }
  0x1f   :  { %1125 = vmatprep.subr.bf16.mxu1 %v1358_v0  ;;  %1131 = vmatprep.subr.bf16.mxu0 %v1358_v0 }
  0x22   :  { %1126 = vmatpush3.bf16.msra.mxu1 %v1419_v5 }
  0x23   :  { %1139 = vmatprep.subr.bf16.mxu1 %v1358_v0 }
  0xeb   :  { %v88_v7 = vpop.f32.mrb[0].mxu0 }
  0xec   :  { %v1105_v8 = vpop.f32.mrb[1].mxu0  ;;  %v1442_v16 = vadd.f32 %v1047_v10, %v88_v7 }
  0xed   :  { %v91_v9 = vpop.f32.mrb[2].mxu0 }
  0xee   :  { %v1106_v11 = vpop.f32.mrb[3].mxu0  ;;  %v1440_v13 = vadd.f32 %v1047_v10, %v91_v9 }
  0xf0   :  { %v149_v12 = vpop.f32.mrb[0].mxu1 }
  0xf1   :  { %v156_v14 = vrot.slane %v149_v12, 1  ;;  %v1113_v15 = vpop.f32.mrb[1].mxu1  ;;  %v159_v20 = vadd.f32 %v149_v12, %v1442_v16 }
  0xf2   :  { %v152_v17 = vpop.f32.mrb[2].mxu1 }
  0xf3   :  { %v160_v18 = vadd.f32 %v156_v14, %v1440_v13  ;;  %v1114_v19 = vpop.f32.mrb[3].mxu1  ;;  %v1052_v24 = vmul.f32 -1.442695, %v159_v20 }
  0xf5   :  { %1181 = vtanh.f32 %v160_v18  ;;  %v1053_v23 = vmul.f32 -1.442695, %v160_v18 }
  0xf6   :  { %1183 = vtanh.f32 %v159_v20 }
  0xf7   :  { %1185 = vpow2.f32 %v1053_v23 }
  0xf8   :  { %1187 = vpow2.f32 %v1052_v24 }
  0xff   :  { %v1182_v21 = vpop.eup %1181 }
 0x100   :  { %181 = vrot.lane.b32.xlu0 %v1182_v21, %s1361_s6  ;;  %v1184_v22 = vpop.eup %1183 }
 0x101   :  { %v1186_v25 = vpop.eup %1185 }
 0x102   :  { %v168_v26 = vadd.f32 1.0, %v1186_v25  ;;  %v1188_v27 = vpop.eup %1187 }
 0x103   :  { %v167_v28 = vadd.f32 1.0, %v1188_v27 }
 0x104   :  { %179 = vrot.lane.b32.xlu0 %v1184_v22, %s1361_s6  ;;  %1189 = vrcp.f32 %v168_v26 }
 0x105   :  { %1191 = vrcp.f32 %v167_v28 }
 0x10e   :  { %v1190_v29 = vpop.eup %1189 }
 0x10f   :  { %v1192_v32 = vpop.eup %1191  ;;  %v176_v35 = vmul.f32 0.0, %v1190_v29 }
 0x110   :  { %v175_v38 = vmul.f32 0.0, %v1192_v32 }
 0x172   :  { %v182_v30 = vpop.permute.xlu0 %181 }
 0x173   :  { %v186_v31 = vmul.f32 %v1190_v29, %v182_v30 }
 0x175   :  { %191 = vrot.lane.b32.xlu1 %v186_v31, %s1362_s3 }
 0x176   :  { %v180_v33 = vpop.permute.xlu0 %179 }
 0x177   :  { %v185_v34 = vmul.f32 %v1192_v32, %v180_v33 }
 0x179   :  { %189 = vrot.lane.b32.xlu1 %v185_v34, %s1362_s3 }
 0x1e7   :  { %v192_v36 = vpop.permute.xlu1 %191 }
 0x1e8   :  { %v1450_v37 = vadd.f32 %v192_v36, %v176_v35 }
 0x1ea   :  { %1193 = vtanh.f32 %v1450_v37  ;;  %v287_v17 = vrot.slane %v1450_v37, 7 }
 0x1eb   :  { %v190_v39 = vpop.permute.xlu1 %189 }
 0x1ec   :  { %v1453_v40 = vadd.f32 %v190_v39, %v175_v38 }
 0x1ee   :  { %1195 = vtanh.f32 %v1453_v40  ;;  %v286_v19 = vrot.slane %v1453_v40, 7 }
 0x1f4   :  { %v1194_v41 = vpop.eup %1193 }
 0x1f5   :  { %203 = vrot.lane.b32.xlu0 %v1194_v41, %s1361_s6 }
 0x1f8   :  { %v1196_v42 = vpop.eup %1195 }
 0x1f9   :  { %201 = vrot.lane.b32.xlu1 %v1196_v42, %s1361_s6 }
 0x267   :  { %v204_v43 = vpop.permute.xlu0 %203 }
 0x268   :  { %v208_v44 = vmul.f32 %v1190_v29, %v204_v43 }
 0x26a   :  { %v210_v45 = vpack.c.bf16 %v208_v44, %v208_v44 }
 0x26b   :  { %v202_v46 = vpop.permute.xlu1 %201 }
 0x26c   :  { %v214_v47 = vunpack.c.l.b16 %v210_v45  ;;  %v207_v48 = vmul.f32 %v1192_v32, %v202_v46 }
 0x26e   :  { %v209_v49 = vpack.c.bf16 %v207_v48, %v207_v48  ;;  %v215_v50 = vrot.slane %v214_v47, 7 }
 0x270   :  { %v213_v51 = vunpack.c.l.b16 %v209_v49 }
 0x272   :  { %v217_v52 = vsel %vm216_vm3, %v215_v50, %v213_v51 }
 0x273   :  { %v218_v53 = vpack.c.b16 %v217_v52, %v217_v52 }
 0x275   :  { %219 = vrot.lane.b32.xlu0 %v218_v53, %s1362_s3 }
 0x2e7   :  { %v220_v54 = vpop.permute.xlu0 %219 }
 0x2e8   :  { %1120 = vmatmul.mubr.msk.bf16.vlgmr.msra.gmra.mrb[4].mxu0 %vm111_vm4, %v220_v54 }
 0x2e9   :  { %1132 = vmatpush3.bf16.msra.mxu0 %v1410_v3  ;;  %1135 = vmatprep.mubr.msk.bf16.mxu0 %vm1359_vm0, %v1358_v0 }
 0x2ea   :  { %1133 = vmatprep.subr.bf16.mxu0 %v1358_v0 }
 0x2ed   :  { %1134 = vmatpush3.bf16.msra.mxu0 %v1419_v5 }
 0x2ee   :  { %1147 = vmatprep.subr.bf16.mxu0 %v1358_v0 }
 0x3bb   :  { %v258_v55 = vpop.f32.mrb[4].mxu0 }
 0x3bc   :  { %v265_v56 = vrot.slane %v258_v55, 7  ;;  %v269_v57 = vadd.f32 %v258_v55, %v1440_v13  ;;  %v1121_v58 = vpop.f32.mrb[5].mxu0 }
 0x3bd   :  { %v261_v59 = vpop.f32.mrb[6].mxu0 }
 0x3be   :  { %v268_v60 = vadd.f32 %v265_v56, %v1442_v16  ;;  %1197 = vtanh.f32 %v269_v57  ;;  %v1122_v61 = vpop.f32.mrb[7].mxu0  ;;  %v1056_v1 = vmul.f32 -1.442695, %v269_v57 }
 0x3c0   :  { %1199 = vtanh.f32 %v268_v60  ;;  %v1055_v2 = vmul.f32 -1.442695, %v268_v60 }
 0x3c1   :  { %1201 = vpow2.f32 %v1056_v1 }
 0x3c2   :  { %1203 = vpow2.f32 %v1055_v2 }
 0x3c8   :  { %v1198_v62 = vpop.eup %1197 }
 0x3c9   :  { %296 = vrot.lane.b32.xlu0 %v1198_v62, %s1361_s6 }
 0x3ca   :  { %v1200_v63 = vpop.eup %1199 }
 0x3cb   :  { %294 = vrot.lane.b32.xlu1 %v1200_v63, %s1361_s6  ;;  %v1202_v4 = vpop.eup %1201 }
 0x3cc   :  { %v1204_v6 = vpop.eup %1203  ;;  %v277_v7 = vadd.f32 1.0, %v1202_v4 }
 0x3cd   :  { %v276_v8 = vadd.f32 1.0, %v1204_v6 }
 0x3ce   :  { %1205 = vrcp.f32 %v277_v7 }
 0x3cf   :  { %1207 = vrcp.f32 %v276_v8 }
 0x3d8   :  { %v1206_v9 = vpop.eup %1205 }
 0x3d9   :  { %v1208_v12 = vpop.eup %1207  ;;  %v291_v18 = vmul.f32 %v1206_v9, %v287_v17 }
 0x3da   :  { %v290_v22 = vmul.f32 %v1208_v12, %v286_v19 }
 0x43b   :  { %v297_v10 = vpop.permute.xlu0 %296 }
 0x43c   :  { %v301_v11 = vmul.f32 %v1206_v9, %v297_v10 }
 0x43d   :  { %v295_v14 = vpop.permute.xlu1 %294 }
 0x43e   :  { %306 = vrot.lane.b32.xlu0 %v301_v11, %s1362_s3  ;;  %v300_v15 = vmul.f32 %v1208_v12, %v295_v14 }
 0x440   :  { %304 = vrot.lane.b32.xlu1 %v300_v15, %s1362_s3 }
 0x4b0   :  { %v307_v20 = vpop.permute.xlu0 %306 }
 0x4b1   :  { %v1475_v21 = vadd.f32 %v307_v20, %v291_v18 }
 0x4b2   :  { %v305_v23 = vpop.permute.xlu1 %304 }
 0x4b3   :  { %1209 = vtanh.f32 %v1475_v21  ;;  %v310_v24 = vadd.f32 %v305_v23, %v290_v22  ;;  %v402_v62 = vrot.slane %v1475_v21, 7 }
 0x4b5   :  { %1211 = vtanh.f32 %v310_v24  ;;  %v401_v61 = vrot.slane %v310_v24, 7 }
 0x4bd   :  { %v1210_v25 = vpop.eup %1209 }
 0x4be   :  { %318 = vrot.lane.b32.xlu0 %v1210_v25, %s1361_s6 }
 0x4bf   :  { %v1212_v26 = vpop.eup %1211 }
 0x4c0   :  { %316 = vrot.lane.b32.xlu1 %v1212_v26, %s1361_s6 }
 0x530   :  { %v319_v27 = vpop.permute.xlu0 %318 }
 0x531   :  { %v323_v28 = vmul.f32 %v1206_v9, %v319_v27 }
 0x532   :  { %v317_v29 = vpop.permute.xlu1 %316 }
 0x533   :  { %v322_v30 = vmul.f32 %v1208_v12, %v317_v29  ;;  %v325_v31 = vpack.c.bf16 %v323_v28, %v323_v28 }
 0x535   :  { %v324_v32 = vpack.c.bf16 %v322_v30, %v322_v30  ;;  %v329_v34 = vunpack.c.l.b16 %v325_v31 }
 0x537   :  { %v328_v33 = vunpack.c.l.b16 %v324_v32 }
 0x539   :  { %v330_v35 = vrot.slane %v328_v33, 1 }
 0x53b   :  { %v331_v36 = vsel %vm216_vm3, %v329_v34, %v330_v35 }
 0x53c   :  { %v332_v37 = vpack.c.b16 %v331_v36, %v331_v36 }
 0x53e   :  { %333 = vrot.lane.b32.xlu1 %v332_v37, %s1362_s3 }
 0x5b0   :  { %v334_v38 = vpop.permute.xlu1 %333 }
 0x5b1   :  { %1128 = vmatmul.mubr.msk.bf16.vlgmr.msra.gmra.mrb[4].mxu1 %vm111_vm4, %v334_v38 }
 0x5b2   :  { %1140 = vmatpush3.bf16.msra.mxu1 %v1410_v3  ;;  %1143 = vmatprep.mubr.msk.bf16.mxu1 %vm1359_vm0, %v1358_v0 }
 0x5b3   :  { %1141 = vmatprep.subr.bf16.mxu1 %v1358_v0 }
 0x5b6   :  { %1142 = vmatpush3.bf16.msra.mxu1 %v1419_v5 }
 0x5b7   :  { %1155 = vmatprep.subr.bf16.mxu1 %v1358_v0 }
 0x684   :  { %v372_v39 = vpop.f32.mrb[4].mxu1 }
 0x685   :  { %v379_v40 = vrot.slane %v372_v39, 6  ;;  %v380_v41 = vrot.slane %v372_v39, 7  ;;  %v1129_v42 = vpop.f32.mrb[5].mxu1 }
 0x686   :  { %v375_v43 = vpop.f32.mrb[6].mxu1 }
 0x687   :  { %v383_v44 = vadd.f32 %v379_v40, %v1442_v16  ;;  %v384_v45 = vadd.f32 %v380_v41, %v1440_v13  ;;  %v1130_v46 = vpop.f32.mrb[7].mxu1 }
 0x689   :  { %1213 = vtanh.f32 %v383_v44  ;;  %v1058_v49 = vmul.f32 -1.442695, %v383_v44  ;;  %v1059_v50 = vmul.f32 -1.442695, %v384_v45 }
 0x68a   :  { %1215 = vtanh.f32 %v384_v45 }
 0x68b   :  { %1217 = vpow2.f32 %v1058_v49 }
 0x68c   :  { %1219 = vpow2.f32 %v1059_v50 }
 0x693   :  { %v1214_v47 = vpop.eup %1213 }
 0x694   :  { %v1216_v48 = vpop.eup %1215  ;;  %409 = vrot.lane.b32.xlu0 %v1214_v47, %s1361_s6 }
 0x695   :  { %411 = vrot.lane.b32.xlu1 %v1216_v48, %s1361_s6  ;;  %v1218_v51 = vpop.eup %1217 }
 0x696   :  { %v1220_v52 = vpop.eup %1219  ;;  %v391_v53 = vadd.f32 1.0, %v1218_v51 }
 0x697   :  { %v392_v54 = vadd.f32 1.0, %v1220_v52 }
 0x698   :  { %1221 = vrcp.f32 %v391_v53 }
 0x699   :  { %1223 = vrcp.f32 %v392_v54 }
 0x6a2   :  { %v1222_v55 = vpop.eup %1221 }
 0x6a3   :  { %v1224_v57 = vpop.eup %1223  ;;  %v405_v63 = vmul.f32 %v1222_v55, %v401_v61 }
 0x6a4   :  { %v406_v1 = vmul.f32 %v1224_v57, %v402_v62 }
 0x706   :  { %v410_v56 = vpop.permute.xlu0 %409 }
 0x707   :  { %v412_v58 = vpop.permute.xlu1 %411  ;;  %v415_v59 = vmul.f32 %v1222_v55, %v410_v56 }
 0x708   :  { %v416_v60 = vmul.f32 %v1224_v57, %v412_v58 }
 0x709   :  { %419 = vrot.lane.b32.xlu0 %v415_v59, %s1362_s3 }
 0x70a   :  { %421 = vrot.lane.b32.xlu1 %v416_v60, %s1362_s3 }
 0x77b   :  { %v420_v2 = vpop.permute.xlu0 %419 }
 0x77c   :  { %v422_v4 = vpop.permute.xlu1 %421  ;;  %v1496_v6 = vadd.f32 %v420_v2, %v405_v63 }
 0x77d   :  { %v1498_v7 = vadd.f32 %v422_v4, %v406_v1 }
 0x77e   :  { %1225 = vtanh.f32 %v1496_v6  ;;  %v517_v47 = vrot.slane %v1496_v6, 7 }
 0x77f   :  { %1227 = vtanh.f32 %v1498_v7  ;;  %v518_v48 = vrot.slane %v1498_v7, 7 }
 0x788   :  { %v1226_v8 = vpop.eup %1225 }
 0x789   :  { %v1228_v9 = vpop.eup %1227  ;;  %431 = vrot.lane.b32.xlu0 %v1226_v8, %s1361_s6 }
 0x78a   :  { %433 = vrot.lane.b32.xlu1 %v1228_v9, %s1361_s6 }
 0x7fb   :  { %v432_v10 = vpop.permute.xlu0 %431 }
 0x7fc   :  { %v434_v11 = vpop.permute.xlu1 %433  ;;  %v437_v12 = vmul.f32 %v1222_v55, %v432_v10 }
 0x7fd   :  { %v438_v14 = vmul.f32 %v1224_v57, %v434_v11 }
 0x7fe   :  { %v439_v15 = vpack.c.bf16 %v437_v12, %v437_v12 }
 0x7ff   :  { %v440_v17 = vpack.c.bf16 %v438_v14, %v438_v14 }
 0x800   :  { %v443_v18 = vunpack.c.l.b16 %v439_v15 }
 0x801   :  { %v444_v19 = vunpack.c.l.b16 %v440_v17 }
 0x802   :  { %v445_v20 = vrot.slane %v443_v18, 2 }
 0x803   :  { %v446_v21 = vrot.slane %v444_v19, 1 }
 0x805   :  { %v447_v22 = vsel %vm216_vm3, %v446_v21, %v445_v20 }
 0x806   :  { %v448_v23 = vpack.c.b16 %v447_v22, %v447_v22 }
 0x808   :  { %449 = vrot.lane.b32.xlu0 %v448_v23, %s1362_s3 }
 0x87a   :  { %v450_v24 = vpop.permute.xlu0 %449 }
 0x87b   :  { %1136 = vmatmul.mubr.msk.bf16.vlgmr.msra.gmra.mrb[8].mxu0 %vm111_vm4, %v450_v24 }
 0x87c   :  { %1148 = vmatpush3.bf16.msra.mxu0 %v1410_v3  ;;  %1151 = vmatprep.mubr.msk.bf16.mxu0 %vm1359_vm0, %v1358_v0 }
 0x87d   :  { %1149 = vmatprep.subr.bf16.mxu0 %v1358_v0 }
 0x880   :  { %1150 = vmatpush3.bf16.msra.mxu0 %v1419_v5 }
 0x881   :  { %1163 = vmatprep.subr.bf16.mxu0 %v1358_v0 }
 0x94e   :  { %v488_v25 = vpop.f32.mrb[8].mxu0 }
 0x94f   :  { %v495_v26 = vrot.slane %v488_v25, 5  ;;  %v496_v27 = vrot.slane %v488_v25, 6  ;;  %v1137_v28 = vpop.f32.mrb[9].mxu0 }
 0x950   :  { %v491_v29 = vpop.f32.mrb[10].mxu0 }
 0x951   :  { %v499_v30 = vadd.f32 %v495_v26, %v1442_v16  ;;  %v500_v31 = vadd.f32 %v496_v27, %v1440_v13  ;;  %v1138_v32 = vpop.f32.mrb[11].mxu0 }
 0x953   :  { %1229 = vtanh.f32 %v499_v30  ;;  %v1061_v35 = vmul.f32 -1.442695, %v499_v30  ;;  %v1062_v36 = vmul.f32 -1.442695, %v500_v31 }
 0x954   :  { %1231 = vtanh.f32 %v500_v31 }
 0x955   :  { %1233 = vpow2.f32 %v1061_v35 }
 0x956   :  { %1235 = vpow2.f32 %v1062_v36 }
 0x95d   :  { %v1230_v33 = vpop.eup %1229 }
 0x95e   :  { %v1232_v34 = vpop.eup %1231  ;;  %525 = vrot.lane.b32.xlu1 %v1230_v33, %s1361_s6 }
 0x95f   :  { %527 = vrot.lane.b32.xlu0 %v1232_v34, %s1361_s6  ;;  %v1234_v37 = vpop.eup %1233 }
 0x960   :  { %v1236_v38 = vpop.eup %1235  ;;  %v507_v39 = vadd.f32 1.0, %v1234_v37 }
 0x961   :  { %v508_v40 = vadd.f32 1.0, %v1236_v38 }
 0x962   :  { %1237 = vrcp.f32 %v507_v39 }
 0x963   :  { %1239 = vrcp.f32 %v508_v40 }
 0x96c   :  { %v1238_v41 = vpop.eup %1237 }
 0x96d   :  { %v1240_v43 = vpop.eup %1239  ;;  %v521_v49 = vmul.f32 %v1238_v41, %v517_v47 }
 0x96e   :  { %v522_v50 = vmul.f32 %v1240_v43, %v518_v48 }
 0x9d0   :  { %v526_v42 = vpop.permute.xlu1 %525 }
 0x9d1   :  { %v528_v44 = vpop.permute.xlu0 %527  ;;  %v531_v45 = vmul.f32 %v1238_v41, %v526_v42 }
 0x9d2   :  { %v532_v46 = vmul.f32 %v1240_v43, %v528_v44 }
 0x9d3   :  { %535 = vrot.lane.b32.xlu1 %v531_v45, %s1362_s3 }
 0x9d4   :  { %537 = vrot.lane.b32.xlu0 %v532_v46, %s1362_s3 }
 0xa45   :  { %v536_v51 = vpop.permute.xlu1 %535 }
 0xa46   :  { %v538_v52 = vpop.permute.xlu0 %537  ;;  %v541_v53 = vadd.f32 %v536_v51, %v521_v49 }
 0xa47   :  { %v542_v54 = vadd.f32 %v538_v52, %v522_v50 }
 0xa48   :  { %1241 = vtanh.f32 %v541_v53  ;;  %v633_v33 = vrot.slane %v541_v53, 7 }
 0xa49   :  { %1243 = vtanh.f32 %v542_v54  ;;  %v634_v34 = vrot.slane %v542_v54, 7 }
 0xa52   :  { %v1242_v55 = vpop.eup %1241 }
 0xa53   :  { %v1244_v56 = vpop.eup %1243  ;;  %547 = vrot.lane.b32.xlu1 %v1242_v55, %s1361_s6 }
 0xa54   :  { %549 = vrot.lane.b32.xlu0 %v1244_v56, %s1361_s6 }
 0xac5   :  { %v548_v57 = vpop.permute.xlu1 %547 }
 0xac6   :  { %v550_v58 = vpop.permute.xlu0 %549  ;;  %v553_v59 = vmul.f32 %v1238_v41, %v548_v57 }
 0xac7   :  { %v554_v60 = vmul.f32 %v1240_v43, %v550_v58 }
 0xac8   :  { %v555_v61 = vpack.c.bf16 %v553_v59, %v553_v59 }
 0xac9   :  { %v556_v62 = vpack.c.bf16 %v554_v60, %v554_v60 }
 0xaca   :  { %v559_v63 = vunpack.c.l.b16 %v555_v61 }
 0xacb   :  { %v560_v1 = vunpack.c.l.b16 %v556_v62 }
 0xacc   :  { %v561_v2 = vrot.slane %v559_v63, 3 }
 0xacd   :  { %v562_v4 = vrot.slane %v560_v1, 2 }
 0xacf   :  { %v563_v6 = vsel %vm216_vm3, %v562_v4, %v561_v2 }
 0xad0   :  { %v564_v7 = vpack.c.b16 %v563_v6, %v563_v6 }
 0xad2   :  { %565 = vrot.lane.b32.xlu1 %v564_v7, %s1362_s3 }
 0xb44   :  { %v566_v8 = vpop.permute.xlu1 %565 }
 0xb45   :  { %1144 = vmatmul.mubr.msk.bf16.vlgmr.msra.gmra.mrb[8].mxu1 %vm111_vm4, %v566_v8 }
 0xb46   :  { %1156 = vmatpush3.bf16.msra.mxu1 %v1410_v3  ;;  %1159 = vmatprep.mubr.msk.bf16.mxu1 %vm1359_vm0, %v1358_v0 }
 0xb47   :  { %1157 = vmatprep.subr.bf16.mxu1 %v1358_v0 }
 0xb4a   :  { %1158 = vmatpush3.bf16.msra.mxu1 %v1419_v5 }
 0xc18   :  { %v604_v9 = vpop.f32.mrb[8].mxu1 }
 0xc19   :  { %v611_v10 = vrot.slane %v604_v9, 4  ;;  %v612_v11 = vrot.slane %v604_v9, 5  ;;  %v1145_v12 = vpop.f32.mrb[9].mxu1 }
 0xc1a   :  { %v607_v14 = vpop.f32.mrb[10].mxu1 }
 0xc1b   :  { %v615_v15 = vadd.f32 %v611_v10, %v1442_v16  ;;  %v616_v17 = vadd.f32 %v612_v11, %v1440_v13  ;;  %v1146_v18 = vpop.f32.mrb[11].mxu1 }
 0xc1d   :  { %1245 = vtanh.f32 %v615_v15  ;;  %v1064_v21 = vmul.f32 -1.442695, %v615_v15  ;;  %v1065_v22 = vmul.f32 -1.442695, %v616_v17 }
 0xc1e   :  { %1247 = vtanh.f32 %v616_v17 }
 0xc1f   :  { %1249 = vpow2.f32 %v1064_v21 }
 0xc20   :  { %1251 = vpow2.f32 %v1065_v22 }
 0xc27   :  { %v1246_v19 = vpop.eup %1245 }
 0xc28   :  { %v1248_v20 = vpop.eup %1247  ;;  %641 = vrot.lane.b32.xlu0 %v1246_v19, %s1361_s6 }
 0xc29   :  { %643 = vrot.lane.b32.xlu1 %v1248_v20, %s1361_s6  ;;  %v1250_v23 = vpop.eup %1249 }
 0xc2a   :  { %v1252_v24 = vpop.eup %1251  ;;  %v623_v25 = vadd.f32 1.0, %v1250_v23 }
 0xc2b   :  { %v624_v26 = vadd.f32 1.0, %v1252_v24 }
 0xc2c   :  { %1253 = vrcp.f32 %v623_v25 }
 0xc2d   :  { %1255 = vrcp.f32 %v624_v26 }
 0xc36   :  { %v1254_v27 = vpop.eup %1253 }
 0xc37   :  { %v1256_v29 = vpop.eup %1255  ;;  %v637_v35 = vmul.f32 %v1254_v27, %v633_v33 }
 0xc38   :  { %v638_v36 = vmul.f32 %v1256_v29, %v634_v34 }
 0xc9a   :  { %v642_v28 = vpop.permute.xlu0 %641 }
 0xc9b   :  { %v644_v30 = vpop.permute.xlu1 %643  ;;  %v647_v31 = vmul.f32 %v1254_v27, %v642_v28 }
 0xc9c   :  { %v648_v32 = vmul.f32 %v1256_v29, %v644_v30 }
 0xc9d   :  { %651 = vrot.lane.b32.xlu0 %v647_v31, %s1362_s3 }
 0xc9e   :  { %653 = vrot.lane.b32.xlu1 %v648_v32, %s1362_s3 }
 0xd0f   :  { %v652_v37 = vpop.permute.xlu0 %651 }
 0xd10   :  { %v654_v38 = vpop.permute.xlu1 %653  ;;  %v657_v39 = vadd.f32 %v652_v37, %v637_v35 }
 0xd11   :  { %v658_v40 = vadd.f32 %v654_v38, %v638_v36 }
 0xd12   :  { %1257 = vtanh.f32 %v657_v39  ;;  %v749_v15 = vrot.slane %v657_v39, 7 }
 0xd13   :  { %1259 = vtanh.f32 %v658_v40  ;;  %v750_v17 = vrot.slane %v658_v40, 7 }
 0xd1c   :  { %v1258_v41 = vpop.eup %1257 }
 0xd1d   :  { %v1260_v42 = vpop.eup %1259  ;;  %663 = vrot.lane.b32.xlu0 %v1258_v41, %s1361_s6 }
 0xd1e   :  { %665 = vrot.lane.b32.xlu1 %v1260_v42, %s1361_s6 }
 0xd8f   :  { %v664_v43 = vpop.permute.xlu0 %663 }
 0xd90   :  { %v666_v44 = vpop.permute.xlu1 %665  ;;  %v669_v45 = vmul.f32 %v1254_v27, %v664_v43 }
 0xd91   :  { %v670_v46 = vmul.f32 %v1256_v29, %v666_v44 }
 0xd92   :  { %v671_v47 = vpack.c.bf16 %v669_v45, %v669_v45 }
 0xd93   :  { %v672_v48 = vpack.c.bf16 %v670_v46, %v670_v46 }
 0xd94   :  { %v675_v49 = vunpack.c.l.b16 %v671_v47 }
 0xd95   :  { %v676_v50 = vunpack.c.l.b16 %v672_v48 }
 0xd96   :  { %v677_v51 = vrot.slane %v675_v49, 4 }
 0xd97   :  { %v678_v52 = vrot.slane %v676_v50, 3 }
 0xd99   :  { %v679_v53 = vsel %vm216_vm3, %v678_v52, %v677_v51 }
 0xd9a   :  { %v680_v54 = vpack.c.b16 %v679_v53, %v679_v53 }
 0xd9c   :  { %681 = vrot.lane.b32.xlu0 %v680_v54, %s1362_s3 }
 0xe0e   :  { %v682_v55 = vpop.permute.xlu0 %681 }
 0xe0f   :  { %1152 = vmatmul.mubr.msk.bf16.vlgmr.msra.gmra.mrb[12].mxu0 %vm111_vm4, %v682_v55 }
 0xe10   :  { %1164 = vmatpush3.bf16.msra.mxu0 %v1410_v3  ;;  %1167 = vmatprep.mubr.msk.bf16.mxu0 %vm1359_vm0, %v1358_v0 }
 0xe11   :  { %1165 = vmatprep.subr.bf16.mxu0 %v1358_v0 }
 0xe14   :  { %1166 = vmatpush3.bf16.msra.mxu0 %v1419_v5 }
 0xee2   :  { %v720_v56 = vpop.f32.mrb[12].mxu0 }
 0xee3   :  { %v727_v57 = vrot.slane %v720_v56, 3  ;;  %v728_v58 = vrot.slane %v720_v56, 4  ;;  %v1153_v59 = vpop.f32.mrb[13].mxu0 }
 0xee4   :  { %v723_v60 = vpop.f32.mrb[14].mxu0 }
 0xee5   :  { %v731_v61 = vadd.f32 %v727_v57, %v1442_v16  ;;  %v732_v62 = vadd.f32 %v728_v58, %v1440_v13  ;;  %v1154_v63 = vpop.f32.mrb[15].mxu0 }
 0xee7   :  { %1261 = vtanh.f32 %v731_v61  ;;  %v1067_v0 = vmul.f32 -1.442695, %v731_v61  ;;  %v1068_v5 = vmul.f32 -1.442695, %v732_v62 }
 0xee8   :  { %1263 = vtanh.f32 %v732_v62 }
 0xee9   :  { %1265 = vpow2.f32 %v1067_v0 }
 0xeea   :  { %1267 = vpow2.f32 %v1068_v5 }
 0xef1   :  { %v1262_v3 = vpop.eup %1261 }
 0xef2   :  { %v1264_v1 = vpop.eup %1263  ;;  %757 = vrot.lane.b32.xlu1 %v1262_v3, %s1361_s6 }
 0xef3   :  { %759 = vrot.lane.b32.xlu0 %v1264_v1, %s1361_s6  ;;  %v1266_v2 = vpop.eup %1265 }
 0xef4   :  { %v1268_v4 = vpop.eup %1267  ;;  %v739_v6 = vadd.f32 1.0, %v1266_v2 }
 0xef5   :  { %v740_v7 = vadd.f32 1.0, %v1268_v4 }
 0xef6   :  { %1269 = vrcp.f32 %v739_v6 }
 0xef7   :  { %1271 = vrcp.f32 %v740_v7 }
 0xf00   :  { %v1270_v8 = vpop.eup %1269 }
 0xf01   :  { %v1272_v10 = vpop.eup %1271  ;;  %v753_v18 = vmul.f32 %v1270_v8, %v749_v15 }
 0xf02   :  { %v754_v19 = vmul.f32 %v1272_v10, %v750_v17 }
 0xf64   :  { %v758_v9 = vpop.permute.xlu1 %757 }
 0xf65   :  { %v760_v11 = vpop.permute.xlu0 %759  ;;  %v763_v12 = vmul.f32 %v1270_v8, %v758_v9 }
 0xf66   :  { %v764_v14 = vmul.f32 %v1272_v10, %v760_v11 }
 0xf67   :  { %767 = vrot.lane.b32.xlu1 %v763_v12, %s1362_s3 }
 0xf68   :  { %769 = vrot.lane.b32.xlu0 %v764_v14, %s1362_s3 }
 0xfd9   :  { %v768_v20 = vpop.permute.xlu1 %767 }
 0xfda   :  { %v770_v21 = vpop.permute.xlu0 %769  ;;  %v773_v22 = vadd.f32 %v768_v20, %v753_v18 }
 0xfdb   :  { %v774_v23 = vadd.f32 %v770_v21, %v754_v19 }
 0xfdc   :  { %1273 = vtanh.f32 %v773_v22  ;;  %v865_v61 = vrot.slane %v773_v22, 7 }
 0xfdd   :  { %1275 = vtanh.f32 %v774_v23  ;;  %v866_v62 = vrot.slane %v774_v23, 7 }
 0xfe6   :  { %v1274_v24 = vpop.eup %1273 }
 0xfe7   :  { %v1276_v25 = vpop.eup %1275  ;;  %779 = vrot.lane.b32.xlu1 %v1274_v24, %s1361_s6 }
 0xfe8   :  { %781 = vrot.lane.b32.xlu0 %v1276_v25, %s1361_s6 }
0x1059   :  { %v780_v26 = vpop.permute.xlu1 %779 }
0x105a   :  { %v782_v27 = vpop.permute.xlu0 %781  ;;  %v785_v28 = vmul.f32 %v1270_v8, %v780_v26 }
0x105b   :  { %v786_v29 = vmul.f32 %v1272_v10, %v782_v27 }
0x105c   :  { %v787_v30 = vpack.c.bf16 %v785_v28, %v785_v28 }
0x105d   :  { %v788_v31 = vpack.c.bf16 %v786_v29, %v786_v29 }
0x105e   :  { %v791_v32 = vunpack.c.l.b16 %v787_v30 }
0x105f   :  { %v792_v33 = vunpack.c.l.b16 %v788_v31 }
0x1060   :  { %v793_v34 = vrot.slane %v791_v32, 5 }
0x1061   :  { %v794_v35 = vrot.slane %v792_v33, 4 }
0x1063   :  { %v795_v36 = vsel %vm216_vm3, %v794_v35, %v793_v34 }
0x1064   :  { %v796_v37 = vpack.c.b16 %v795_v36, %v795_v36 }
0x1066   :  { %797 = vrot.lane.b32.xlu1 %v796_v37, %s1362_s3 }
0x10d8   :  { %v798_v38 = vpop.permute.xlu1 %797 }
0x10d9   :  { %1160 = vmatmul.mubr.msk.bf16.vlgmr.msra.gmra.mrb[12].mxu1 %vm111_vm4, %v798_v38 }
0x11ac   :  { %v836_v39 = vpop.f32.mrb[12].mxu1 }
0x11ad   :  { %v843_v40 = vrot.slane %v836_v39, 2  ;;  %v844_v41 = vrot.slane %v836_v39, 3  ;;  %v1161_v42 = vpop.f32.mrb[13].mxu1 }
0x11ae   :  { %v839_v43 = vpop.f32.mrb[14].mxu1 }
0x11af   :  { %v847_v44 = vadd.f32 %v843_v40, %v1442_v16  ;;  %v848_v45 = vadd.f32 %v844_v41, %v1440_v13  ;;  %v1162_v46 = vpop.f32.mrb[15].mxu1 }
0x11b1   :  { %1277 = vtanh.f32 %v847_v44  ;;  %v1070_v49 = vmul.f32 -1.442695, %v847_v44  ;;  %v1071_v50 = vmul.f32 -1.442695, %v848_v45 }
0x11b2   :  { %1279 = vtanh.f32 %v848_v45 }
0x11b3   :  { %1281 = vpow2.f32 %v1070_v49 }
0x11b4   :  { %1283 = vpow2.f32 %v1071_v50 }
0x11bb   :  { %v1278_v47 = vpop.eup %1277 }
0x11bc   :  { %v1280_v48 = vpop.eup %1279  ;;  %873 = vrot.lane.b32.xlu0 %v1278_v47, %s1361_s6 }
0x11bd   :  { %875 = vrot.lane.b32.xlu1 %v1280_v48, %s1361_s6  ;;  %v1282_v51 = vpop.eup %1281 }
0x11be   :  { %v1284_v52 = vpop.eup %1283  ;;  %v855_v53 = vadd.f32 1.0, %v1282_v51 }
0x11bf   :  { %v856_v54 = vadd.f32 1.0, %v1284_v52 }
0x11c0   :  { %1285 = vrcp.f32 %v855_v53 }
0x11c1   :  { %1287 = vrcp.f32 %v856_v54 }
0x11ca   :  { %v1286_v55 = vpop.eup %1285 }
0x11cb   :  { %v1288_v57 = vpop.eup %1287  ;;  %v869_v63 = vmul.f32 %v1286_v55, %v865_v61 }
0x11cc   :  { %v870_v3 = vmul.f32 %v1288_v57, %v866_v62 }
0x122e   :  { %v874_v56 = vpop.permute.xlu0 %873 }
0x122f   :  { %v876_v58 = vpop.permute.xlu1 %875  ;;  %v879_v59 = vmul.f32 %v1286_v55, %v874_v56 }
0x1230   :  { %v880_v60 = vmul.f32 %v1288_v57, %v876_v58 }
0x1231   :  { %883 = vrot.lane.b32.xlu0 %v879_v59, %s1362_s3 }
0x1232   :  { %885 = vrot.lane.b32.xlu1 %v880_v60, %s1362_s3 }
0x12a3   :  { %v884_v1 = vpop.permute.xlu0 %883 }
0x12a4   :  { %v886_v0 = vpop.permute.xlu1 %885  ;;  %v889_v5 = vadd.f32 %v884_v1, %v869_v63 }
0x12a5   :  { %v890_v2 = vadd.f32 %v886_v0, %v870_v3 }
0x12a6   :  { %1289 = vtanh.f32 %v889_v5  ;;  %v981_v42 = vrot.slane %v889_v5, 7 }
0x12a7   :  { %1291 = vtanh.f32 %v890_v2  ;;  %v982_v43 = vrot.slane %v890_v2, 7 }
0x12b0   :  { %v1290_v4 = vpop.eup %1289 }
0x12b1   :  { %v1292_v6 = vpop.eup %1291  ;;  %895 = vrot.lane.b32.xlu0 %v1290_v4, %s1361_s6 }
0x12b2   :  { %897 = vrot.lane.b32.xlu1 %v1292_v6, %s1361_s6 }
0x1323   :  { %v896_v7 = vpop.permute.xlu0 %895 }
0x1324   :  { %v898_v8 = vpop.permute.xlu1 %897  ;;  %v901_v9 = vmul.f32 %v1286_v55, %v896_v7 }
0x1325   :  { %v902_v10 = vmul.f32 %v1288_v57, %v898_v8 }
0x1326   :  { %v903_v11 = vpack.c.bf16 %v901_v9, %v901_v9 }
0x1327   :  { %v904_v12 = vpack.c.bf16 %v902_v10, %v902_v10 }
0x1328   :  { %v907_v14 = vunpack.c.l.b16 %v903_v11 }
0x1329   :  { %v908_v15 = vunpack.c.l.b16 %v904_v12 }
0x132a   :  { %v909_v17 = vrot.slane %v907_v14, 6 }
0x132b   :  { %v910_v18 = vrot.slane %v908_v15, 5 }
0x132d   :  { %v911_v19 = vsel %vm216_vm3, %v910_v18, %v909_v17 }
0x132e   :  { %v912_v20 = vpack.c.b16 %v911_v19, %v911_v19 }
0x1330   :  { %913 = vrot.lane.b32.xlu0 %v912_v20, %s1362_s3 }
0x13a2   :  { %v914_v21 = vpop.permute.xlu0 %913 }
0x13a3   :  { %1168 = vmatmul.mubr.msk.bf16.vlgmr.msra.gmra.mrb[16].mxu0 %vm111_vm4, %v914_v21 }
0x1476   :  { %v952_v22 = vpop.f32.mrb[16].mxu0 }
0x1477   :  { %v959_v23 = vrot.slane %v952_v22, 1  ;;  %v960_v24 = vrot.slane %v952_v22, 2  ;;  %v1169_v25 = vpop.f32.mrb[17].mxu0 }
0x1478   :  { %v955_v26 = vpop.f32.mrb[18].mxu0 }
0x1479   :  { %v963_v27 = vadd.f32 %v959_v23, %v1442_v16  ;;  %v964_v28 = vadd.f32 %v960_v24, %v1440_v13  ;;  %v1170_v29 = vpop.f32.mrb[19].mxu0 }
0x147b   :  { %1293 = vtanh.f32 %v963_v27  ;;  %v1073_v32 = vmul.f32 -1.442695, %v963_v27  ;;  %v1074_v33 = vmul.f32 -1.442695, %v964_v28 }
0x147c   :  { %1295 = vtanh.f32 %v964_v28 }
0x147d   :  { %1297 = vpow2.f32 %v1073_v32 }
0x147e   :  { %1299 = vpow2.f32 %v1074_v33 }
0x1485   :  { %v1294_v30 = vpop.eup %1293 }
0x1486   :  { %v1296_v31 = vpop.eup %1295  ;;  %989 = vrot.lane.b32.xlu0 %v1294_v30, %s1361_s6 }
0x1487   :  { %991 = vrot.lane.b32.xlu1 %v1296_v31, %s1361_s6  ;;  %v1298_v34 = vpop.eup %1297 }
0x1488   :  { %v1300_v35 = vpop.eup %1299  ;;  %v971_v36 = vadd.f32 1.0, %v1298_v34 }
0x1489   :  { %v972_v37 = vadd.f32 1.0, %v1300_v35 }
0x148a   :  { %1301 = vrcp.f32 %v971_v36 }
0x148b   :  { %1303 = vrcp.f32 %v972_v37 }
0x1494   :  { %v1302_v13 = vpop.eup %1301 }
0x1495   :  { %v1304_v38 = vpop.eup %1303  ;;  %v985_v44 = vmul.f32 %v1302_v13, %v981_v42 }
0x1496   :  { %v986_v45 = vmul.f32 %v1304_v38, %v982_v43 }
0x14f8   :  { %v990_v16 = vpop.permute.xlu0 %989 }
0x14f9   :  { %v992_v39 = vpop.permute.xlu1 %991  ;;  %v995_v40 = vmul.f32 %v1302_v13, %v990_v16 }
0x14fa   :  { %v996_v41 = vmul.f32 %v1304_v38, %v992_v39 }
0x14fb   :  { %999 = vrot.lane.b32.xlu0 %v995_v40, %s1362_s3 }
0x14fc   :  { %1001 = vrot.lane.b32.xlu1 %v996_v41, %s1362_s3 }
0x156d   :  { %v1000_v46 = vpop.permute.xlu0 %999 }
0x156e   :  { %v1002_v47 = vpop.permute.xlu1 %1001  ;;  %v1005_v48 = vadd.f32 %v1000_v46, %v985_v44 }
0x156f   :  { %v1006_v49 = vadd.f32 %v1002_v47, %v986_v45 }
0x1570   :  { %1305 = vtanh.f32 %v1005_v48 }
0x1571   :  { %1307 = vtanh.f32 %v1006_v49 }
0x157a   :  { %v1306_v50 = vpop.eup %1305 }
0x157b   :  { %v1308_v51 = vpop.eup %1307  ;;  %1011 = vrot.lane.b32.xlu0 %v1306_v50, %s1361_s6 }
0x157c   :  { %1013 = vrot.lane.b32.xlu1 %v1308_v51, %s1361_s6 }
0x15ed   :  { %v1012_v52 = vpop.permute.xlu0 %1011 }
0x15ee   :  { %v1014_v53 = vpop.permute.xlu1 %1013  ;;  %v1017_v54 = vmul.f32 %v1302_v13, %v1012_v52 }
0x15ef   :  { %v1018_v55 = vmul.f32 %v1304_v38, %v1014_v53 }
0x15f0   :  { %1022 = vrot.lane.b32.xlu1 %v1017_v54, %s1362_s3 }
0x15f1   :  { %v1021_v56 = vrot.slane %v1018_v55, 7 }
0x15f3   :  { %1024 = vrot.lane.b32.xlu0 %v1021_v56, %s1362_s3 }
0x1662   :  { %v1023_v57 = vpop.permute.xlu1 %1022 }
0x1663   :  { %1029 = vst.msk [vmem:[#allocation5 - $0x7] sm:$0x80] %vm1028_vm5, %v1023_v57 }
0x1665   :  { %v1025_v58 = vpop.permute.xlu0 %1024 }
0x1666   :  { %1031 = vst.msk [vmem:[#allocation5 + $0x1] sm:$0x1] %vm1030_vm6, %v1025_v58 }
0x1667   :  { %1342 = shalt.err (!%p1339_p12)
}
0x1668   :  { %s1343_s12 = scalar_lea.hbm %s1595_s4, 32 }
0x1669   :  { %p1344_p13 = scmp.ne.s32.totalorder %s1595_s4, %s1343_s12  ;;  %p1347_p0 = scmp.lt.u32.totalorder %s1343_s12, %s1595_s4 }
0x166b   :  { %p1349_p1 = pnand %p1347_p0, %p1344_p13 }
0x166d   :  { %1352 = shalt.err (!%p1349_p1)
}
0x166e   :  { %1041 = dma.vmem_to_hbm [thread:$0]  %s1039_s8, 32, %s1595_s4, [#allocation4]  }
0x166f   :  { %1355 = dma.done.wait [#allocation4], 32  }
0x1670   :  { %1356 = vsyncadd [#allocation4], 4294967264 }
0x1671   :  { %1045 = vsyncpa [#allocation3], 1 }
0x1672   :  { %1046 = vsyncpa [#allocation4], 1 }

</bundles_post_ra>
